<compile_context>
chip_gen: v7x
topology: tpu7x:2x2x1
jax: 0.10.0
libtpu: 0.0.40
codegen_flags: <defaults>
</compile_context>

<pallas_src>
import functools

import jax
import jax.numpy as jnp
from jax.experimental import pallas as pl
from jax.experimental.pallas import tpu as pltpu


def _round_up(x, m):
    return ((x + m - 1) // m) * m


def _cdiv(a, b):
    return -(-a // b)


def _fused_mlp_kernel(*refs, n_layers, compute_dtype):
    """refs = (x_ref, w0, b0, w1, b1, ..., w_{L-1}, b_{L-1}, o_ref)."""
    x_ref = refs[0]
    o_ref = refs[-1]
    wb = refs[1:-1]

    h = x_ref[...]                           # (TM, K0), x dtype (f32) -> cast per layer
    for l in range(n_layers):
        w = wb[2 * l][...]                   # (K_pad, N_pad), compute_dtype, VMEM-resident
        b = wb[2 * l + 1][...]               # (1, N_pad), f32, VMEM-resident
        y = jnp.dot(h.astype(compute_dtype), w,
                    preferred_element_type=jnp.float32)   # MXU, f32 accumulation
        y = y + b                            # VPU, f32
        if l != n_layers - 1:
            # Stable sigmoid via a single EUP tanh: sigmoid(y) = 0.5*(tanh(y/2)+1).
            y = 0.5 * (jnp.tanh(0.5 * y) + 1.0)
        h = y                                # stays on-chip between layers
    o_ref[...] = h.astype(o_ref.dtype)


def init_fc_backbone_params(key, input_size, layer_sizes, dtype=jnp.float32):
    """Mirror weights_init: W ~ N(0, 0.01), b = 0. Weights stored transposed (in, out)."""
    sizes = [input_size] + list(layer_sizes)
    params = []
    for l_id in range(len(sizes) - 1):
        key, wk = jax.random.split(key)
        w_t = (0.01 * jax.random.normal(wk, (sizes[l_id], sizes[l_id + 1]))).astype(dtype)
        b = jnp.zeros((sizes[l_id + 1],), dtype=dtype)
        params.append((w_t, b))
    return params


def prepare_fc_backbone_params(params, *, compute_dtype=jnp.bfloat16):
    """One-time prep (outside the forward): pad each layer's OUTPUT dim to 128 lanes, keep the
    input K dim of the first layer unpadded, cast weights to the MXU compute dtype.  Padded
    weight rows/cols and bias entries are zero, so the sigmoid(0)=0.5 values appearing in
    padded activation columns are annihilated by the zero weight rows of the next layer."""
    n_layers = len(params)
    dims = [params[0][0].shape[0]] + [w_t.shape[1] for (w_t, _) in params]
    dims_pad = [dims[0]] + [_round_up(d, 128) for d in dims[1:]]

    wb = []
    for l, (w_t, b) in enumerate(params):
        kl, nl = w_t.shape
        w_p = jnp.zeros((dims_pad[l], dims_pad[l + 1]), compute_dtype)
        w_p = w_p.at[:kl, :nl].set(w_t.astype(compute_dtype))
        b_p = jnp.zeros((1, dims_pad[l + 1]), jnp.float32)
        b_p = b_p.at[0, :nl].set(b.astype(jnp.float32))
        wb += [w_p, b_p]

    return {
        "wb": tuple(wb),
        "dims": dims,
        "dims_pad": dims_pad,
        "n_layers": n_layers,
        "compute_dtype": compute_dtype,
    }


def fc_backbone_forward(x, prepared, *, batch_tile=1024):
    """Fused forward: y = (sigmoid∘linear)^{L-1} ∘ linear (last layer has no sigmoid).

    batch_tile: max rows per grid step.  Default 1024 -> one grid step for small batches
    (best on single-TC v5e/v6e); pass ~ceil(M/2) on v7x for two balanced megacore tiles.
    """
    dims = prepared["dims"]
    dims_pad = prepared["dims_pad"]
    n_layers = prepared["n_layers"]
    compute_dtype = prepared["compute_dtype"]
    wb = prepared["wb"]

    M, K = x.shape
    assert K == dims[0], (K, dims[0])

    # Balanced batch tiles: minimal padding, equal-size tiles (keeps both v7x TCs loaded).
    m8 = _round_up(M, 8)
    n_tiles = max(1, _cdiv(m8, batch_tile))
    tm = _round_up(_cdiv(m8, n_tiles), 8)
    m_pad = n_tiles * tm

    # Only the batch dim may need padding; K is left at its natural size.
    x_p = x if m_pad == M else jnp.pad(x, ((0, m_pad - M), (0, 0)))

    # x / out tiles march over the batch; weights & biases use a constant index_map so they are
    # DMA'd once and stay VMEM-resident across all grid steps.
    in_specs = [pl.BlockSpec((tm, dims_pad[0]), lambda i: (i, 0))]
    for l in range(n_layers):
        in_specs.append(pl.BlockSpec((dims_pad[l], dims_pad[l + 1]), lambda i: (0, 0)))
        in_specs.append(pl.BlockSpec((1, dims_pad[l + 1]), lambda i: (0, 0)))
    out_spec = pl.BlockSpec((tm, dims_pad[-1]), lambda i: (i, 0))

    kernel = functools.partial(
        _fused_mlp_kernel, n_layers=n_layers, compute_dtype=compute_dtype
    )

    out_p = pl.pallas_call(
        kernel,
        out_shape=jax.ShapeDtypeStruct((m_pad, dims_pad[-1]), x.dtype),
        grid=(n_tiles,),
        in_specs=in_specs,
        out_specs=out_spec,
        compiler_params=pltpu.CompilerParams(
            # Batch tiles are independent -> megacore sharding on v7x; harmless on v5e/v6e.
            dimension_semantics=("parallel",),
        ),
    )(x_p, *wb)

    return out_p[:M, :dims[-1]]


def fc_backbone_ref(x, params):
    """Pure-JAX f32 reference for correctness check."""
    n_layers = len(params)
    for l_id, (w_t, b) in enumerate(params):
        x = x @ w_t + b
        if l_id != n_layers - 1:
            x = jax.nn.sigmoid(x)
    return x


if __name__ == "__main__":
    key = jax.random.PRNGKey(0)
    key, xk, xk2 = jax.random.split(key, 3)

    input_size = 32
    layer_sizes = [64, 48, 16]  # last layer has no sigmoid (matches FC_Backbone)
    params = init_fc_backbone_params(key, input_size, layer_sizes)
    prepared = prepare_fc_backbone_params(params)   # one-time pad + bf16 cast

    # Small-batch run: single grid step, no batch padding.
    x = jax.random.normal(xk, (8, input_size), dtype=jnp.float32)
    out = jax.block_until_ready(fc_backbone_forward(x, prepared))
    ref = fc_backbone_ref(x, params)
    assert out.shape == (8, layer_sizes[-1]), out.shape
    # bf16 matmul operands -> relaxed tolerance vs the f32 reference (accuracy contract).
    assert jnp.allclose(out, ref, atol=5e-3, rtol=5e-2), "mismatch vs reference (batch=8)"

    # Awkward batch: default batch_tile -> 1 balanced step of 304 rows (4 padded, sliced off).
    x2 = jax.random.normal(xk2, (300, input_size), dtype=jnp.float32)
    out2 = jax.block_until_ready(fc_backbone_forward(x2, prepared))
    ref2 = fc_backbone_ref(x2, params)
    assert out2.shape == (300, layer_sizes[-1]), out2.shape
    assert jnp.allclose(out2, ref2, atol=5e-3, rtol=5e-2), "mismatch vs reference (batch=300)"

    # Same batch forced onto 2 balanced tiles (v7x-style megacore split) to exercise grid > 1.
    out3 = jax.block_until_ready(fc_backbone_forward(x2, prepared, batch_tile=152))
    assert out3.shape == (300, layer_sizes[-1]), out3.shape
    assert jnp.allclose(out3, ref2, atol=5e-3, rtol=5e-2), "mismatch vs reference (2 tiles)"

    print("KERNEL_OK")
</pallas_src>

<mosaic_0001>
module attributes {stable_mosaic.version = 11 : i64} {
  func.func @_fused_mlp_kernel(%arg0: i32, %arg1: memref<8x32xf32, #tpu.memory_space<vmem>>, %arg2: memref<32x128xbf16, #tpu.memory_space<vmem>>, %arg3: memref<1x128xf32, #tpu.memory_space<vmem>>, %arg4: memref<128x128xbf16, #tpu.memory_space<vmem>>, %arg5: memref<1x128xf32, #tpu.memory_space<vmem>>, %arg6: memref<128x128xbf16, #tpu.memory_space<vmem>>, %arg7: memref<1x128xf32, #tpu.memory_space<vmem>>, %arg8: memref<8x128xf32, #tpu.memory_space<vmem>>) attributes {dimension_semantics = [#tpu.dimension_semantics<parallel>], iteration_bounds = array<i64: 1>, scalar_prefetch = 0 : i64, scratch_operands = 0 : i64, tpu.core_type = #tpu.core_type<tc>, window_params = [{transform_indices = @transform_0, window_bounds = array<i64: 8, 32>}, {pipeline_mode = #tpu.pipeline_mode<synchronous>, transform_indices = @transform_1, window_bounds = array<i64: 32, 128>}, {pipeline_mode = #tpu.pipeline_mode<synchronous>, transform_indices = @transform_2, window_bounds = array<i64: 1, 128>}, {pipeline_mode = #tpu.pipeline_mode<synchronous>, transform_indices = @transform_3, window_bounds = array<i64: 128, 128>}, {pipeline_mode = #tpu.pipeline_mode<synchronous>, transform_indices = @transform_4, window_bounds = array<i64: 1, 128>}, {pipeline_mode = #tpu.pipeline_mode<synchronous>, transform_indices = @transform_5, window_bounds = array<i64: 128, 128>}, {pipeline_mode = #tpu.pipeline_mode<synchronous>, transform_indices = @transform_6, window_bounds = array<i64: 1, 128>}, {transform_indices = @transform_7, window_bounds = array<i64: 8, 128>}]} {
    %c0 = arith.constant 0 : index
    %c0_0 = arith.constant 0 : index
    %0 = vector.load %arg1[%c0, %c0_0] : memref<8x32xf32, #tpu.memory_space<vmem>>, vector<8x32xf32>
    %c0_1 = arith.constant 0 : index
    %c0_2 = arith.constant 0 : index
    %1 = vector.load %arg2[%c0_1, %c0_2] : memref<32x128xbf16, #tpu.memory_space<vmem>>, vector<32x128xbf16>
    %c0_3 = arith.constant 0 : index
    %c0_4 = arith.constant 0 : index
    %2 = vector.load %arg3[%c0_3, %c0_4] : memref<1x128xf32, #tpu.memory_space<vmem>>, vector<1x128xf32>
    %3 = arith.truncf %0 : vector<8x32xf32> to vector<8x32xbf16>
    %cst = arith.constant dense<0.000000e+00> : vector<8x128xf32>
    %4 = tpu.matmul %3, %1, %cst {dimension_numbers = #tpu.dot_dimension_numbers<[1], [0], [0], [1], [0, 0, 1, 1], [], []>} : vector<8x32xbf16>, vector<32x128xbf16>, vector<8x128xf32> -> vector<8x128xf32>
    %5 = vector.broadcast %2 : vector<1x128xf32> to vector<8x128xf32>
    %6 = arith.addf %4, %5 : vector<8x128xf32>
    %cst_5 = arith.constant 5.000000e-01 : f32
    %7 = vector.broadcast %cst_5 : f32 to vector<8x128xf32>
    %8 = arith.mulf %7, %6 : vector<8x128xf32>
    %9 = math.tanh %8 : vector<8x128xf32>
    %cst_6 = arith.constant 1.000000e+00 : f32
    %10 = vector.broadcast %cst_6 : f32 to vector<8x128xf32>
    %11 = arith.addf %9, %10 : vector<8x128xf32>
    %cst_7 = arith.constant 5.000000e-01 : f32
    %12 = vector.broadcast %cst_7 : f32 to vector<8x128xf32>
    %13 = arith.mulf %12, %11 : vector<8x128xf32>
    %c0_8 = arith.constant 0 : index
    %c0_9 = arith.constant 0 : index
    %14 = vector.load %arg4[%c0_8, %c0_9] : memref<128x128xbf16, #tpu.memory_space<vmem>>, vector<128x128xbf16>
    %c0_10 = arith.constant 0 : index
    %c0_11 = arith.constant 0 : index
    %15 = vector.load %arg5[%c0_10, %c0_11] : memref<1x128xf32, #tpu.memory_space<vmem>>, vector<1x128xf32>
    %16 = arith.truncf %13 : vector<8x128xf32> to vector<8x128xbf16>
    %cst_12 = arith.constant dense<0.000000e+00> : vector<8x128xf32>
    %17 = tpu.matmul %16, %14, %cst_12 {dimension_numbers = #tpu.dot_dimension_numbers<[1], [0], [0], [1], [0, 0, 1, 1], [], []>} : vector<8x128xbf16>, vector<128x128xbf16>, vector<8x128xf32> -> vector<8x128xf32>
    %18 = vector.broadcast %15 : vector<1x128xf32> to vector<8x128xf32>
    %19 = arith.addf %17, %18 : vector<8x128xf32>
    %cst_13 = arith.constant 5.000000e-01 : f32
    %20 = vector.broadcast %cst_13 : f32 to vector<8x128xf32>
    %21 = arith.mulf %20, %19 : vector<8x128xf32>
    %22 = math.tanh %21 : vector<8x128xf32>
    %cst_14 = arith.constant 1.000000e+00 : f32
    %23 = vector.broadcast %cst_14 : f32 to vector<8x128xf32>
    %24 = arith.addf %22, %23 : vector<8x128xf32>
    %cst_15 = arith.constant 5.000000e-01 : f32
    %25 = vector.broadcast %cst_15 : f32 to vector<8x128xf32>
    %26 = arith.mulf %25, %24 : vector<8x128xf32>
    %c0_16 = arith.constant 0 : index
    %c0_17 = arith.constant 0 : index
    %27 = vector.load %arg6[%c0_16, %c0_17] : memref<128x128xbf16, #tpu.memory_space<vmem>>, vector<128x128xbf16>
    %c0_18 = arith.constant 0 : index
    %c0_19 = arith.constant 0 : index
    %28 = vector.load %arg7[%c0_18, %c0_19] : memref<1x128xf32, #tpu.memory_space<vmem>>, vector<1x128xf32>
    %29 = arith.truncf %26 : vector<8x128xf32> to vector<8x128xbf16>
    %cst_20 = arith.constant dense<0.000000e+00> : vector<8x128xf32>
    %30 = tpu.matmul %29, %27, %cst_20 {dimension_numbers = #tpu.dot_dimension_numbers<[1], [0], [0], [1], [0, 0, 1, 1], [], []>} : vector<8x128xbf16>, vector<128x128xbf16>, vector<8x128xf32> -> vector<8x128xf32>
    %31 = vector.broadcast %28 : vector<1x128xf32> to vector<8x128xf32>
    %32 = arith.addf %30, %31 : vector<8x128xf32>
    %c0_21 = arith.constant 0 : index
    %c0_22 = arith.constant 0 : index
    %33 = vector.load %arg8[%c0_21, %c0_22] : memref<8x128xf32, #tpu.memory_space<vmem>>, vector<8x128xf32>
    tpu.vector_store %arg8[%c0_21, %c0_22], %32 {strides = array<i32>} : memref<8x128xf32, #tpu.memory_space<vmem>>, vector<8x128xf32>,
    return
  }
  func.func @transform_0(%arg0: i32) -> (i32, i32) {
    %c0_i32 = arith.constant 0 : i32
    %c0_i32_0 = arith.constant 0 : i32
    return %arg0, %c0_i32 : i32, i32
  }
  func.func @transform_1(%arg0: i32) -> (i32, i32) {
    %c0_i32 = arith.constant 0 : i32
    %c0_i32_0 = arith.constant 0 : i32
    %c0_i32_1 = arith.constant 0 : i32
    return %c0_i32, %c0_i32_0 : i32, i32
  }
  func.func @transform_2(%arg0: i32) -> (i32, i32) {
    %c0_i32 = arith.constant 0 : i32
    %c0_i32_0 = arith.constant 0 : i32
    %c0_i32_1 = arith.constant 0 : i32
    return %c0_i32, %c0_i32_0 : i32, i32
  }
  func.func @transform_3(%arg0: i32) -> (i32, i32) {
    %c0_i32 = arith.constant 0 : i32
    %c0_i32_0 = arith.constant 0 : i32
    %c0_i32_1 = arith.constant 0 : i32
    return %c0_i32, %c0_i32_0 : i32, i32
  }
  func.func @transform_4(%arg0: i32) -> (i32, i32) {
    %c0_i32 = arith.constant 0 : i32
    %c0_i32_0 = arith.constant 0 : i32
    %c0_i32_1 = arith.constant 0 : i32
    return %c0_i32, %c0_i32_0 : i32, i32
  }
  func.func @transform_5(%arg0: i32) -> (i32, i32) {
    %c0_i32 = arith.constant 0 : i32
    %c0_i32_0 = arith.constant 0 : i32
    %c0_i32_1 = arith.constant 0 : i32
    return %c0_i32, %c0_i32_0 : i32, i32
  }
  func.func @transform_6(%arg0: i32) -> (i32, i32) {
    %c0_i32 = arith.constant 0 : i32
    %c0_i32_0 = arith.constant 0 : i32
    %c0_i32_1 = arith.constant 0 : i32
    return %c0_i32, %c0_i32_0 : i32, i32
  }
  func.func @transform_7(%arg0: i32) -> (i32, i32) {
    %c0_i32 = arith.constant 0 : i32
    %c0_i32_0 = arith.constant 0 : i32
    return %arg0, %c0_i32 : i32, i32
  }
}

</mosaic_0001>

<bundles_post_ra>
// kernel: tpu_custom_call.1
= control target key start
LH: loop header
LB: loop body
LE: loop exit
PB: predicated region body
PF: predicated region fallthrough
CT: control target
= control target key end

     0   :  { %12 = vsyncpa [#allocation3], 0  ;;  %s791_s0 = inlined_call_operand.hbm [shape: f32[8,32], index: 0, kind: input, shape index: {}]   ;;  %s792_s1 = inlined_call_operand.hbm [shape: bf16[32,128], index: 1, kind: input, shape index: {}]   ;;  %s793_s2 = inlined_call_operand.vmem [shape: f32[1,128], index: 2, kind: input, shape index: {}]   ;;  %s794_s3 = inlined_call_operand.hbm [shape: bf16[128,128], index: 3, kind: input, shape index: {}]   ;;  %s795_s4 = inlined_call_operand.vmem [shape: f32[1,128], index: 4, kind: input, shape index: {}]   ;;  %s796_s5 = inlined_call_operand.hbm [shape: bf16[128,128], index: 5, kind: input, shape index: {}]   ;;  %s797_s6 = inlined_call_operand.vmem [shape: f32[1,128], index: 6, kind: input, shape index: {}]   ;;  %s798_s7 = inlined_call_operand.hbm [shape: f32[8,128], index: 7, kind: output, shape index: {}]  }
   0x1   :  { %13 = vsyncpa [#allocation6], 0 }
   0x2   :  { %14 = vsyncpa [#allocation9], 0 }
   0x3   :  { %15 = vsyncpa [#allocation4], 0  ;;  %s640_s24 = smov [#allocation5]   ;;  %s522_s28 = scalar_lea.hbm %s792_s1, 256 }
   0x4   :  { %s31_s25 = sshll.u32 %s640_s24, 4  ;;  %p523_p0 = scmp.ne.s32.totalorder %s792_s1, %s522_s28  ;;  %s32_s25 = int_to_ptr.vmem [resolvable:$true] %s31_s25 }
   0x5   :  { %p526_p1 = scmp.lt.u32.totalorder %s522_s28, %s792_s1 }
   0x7   :  { %p528_p2 = pnand %p526_p1, %p523_p0 }
   0x9   :  { %531 = shalt.err (!%p528_p2)
}
   0xa   :  { %s532_s10 = scalar_lea.vmem %s32_s25, 256  ;;  %p537_p4 = scmp.lt.s32.totalorder %s32_s25, %s32_s25 }
   0xb   :  { %p533_p3 = scmp.ne.s32.totalorder %s32_s25, %s532_s10  ;;  %p538_p5 = scmp.lt.s32.totalorder %s532_s10, %s532_s10 }
   0xd   :  { %p539_p6 = por %p538_p5, %p537_p4 }
   0xf   :  { %p540_p7 = pnand %p539_p6, %p533_p3 }
  0x11   :  { %543 = shalt.err (!%p540_p7)
}
  0x12   :  { %s641_s11 = smov 64   ;;  %s642_s12 = smov 4  }
  0x13   :  { %37 = dma.hbm_to_vmem [thread:$0]  %s792_s1, 256, %s32_s25, [#allocation6], %s641_s11, %s641_s11, %s642_s12  }
  0x14   :  { %s643_s15 = smov [#allocation2]   ;;  %s644_s17 = smov [#allocation7]  }
  0x15   :  { %s22_s16 = sshll.u32 %s643_s15, 4  ;;  %s45_s18 = sshll.u32 %s644_s17, 4  ;;  %s23_s16 = int_to_ptr.vmem [resolvable:$true] %s22_s16  ;;  %s46_s18 = int_to_ptr.vmem [resolvable:$true] %s45_s18 }
  0x16   :  { %s544_s21 = scalar_lea.hbm %s791_s0, 128 }
  0x17   :  { %p545_p8 = scmp.ne.s32.totalorder %s791_s0, %s544_s21  ;;  %p548_p9 = scmp.lt.u32.totalorder %s544_s21, %s791_s0 }
  0x19   :  { %p550_p10 = pnand %p548_p9, %p545_p8 }
  0x1b   :  { %553 = shalt.err (!%p550_p10)
}
  0x1c   :  { %s554_s1 = scalar_lea.vmem %s23_s16, 128  ;;  %p559_p12 = scmp.lt.s32.totalorder %s23_s16, %s23_s16 }
  0x1d   :  { %p555_p11 = scmp.ne.s32.totalorder %s23_s16, %s554_s1  ;;  %p560_p13 = scmp.lt.s32.totalorder %s554_s1, %s554_s1 }
  0x1f   :  { %p561_p0 = por %p560_p13, %p559_p12 }
  0x21   :  { %p562_p1 = pnand %p561_p0, %p555_p11 }
  0x23   :  { %565 = shalt.err (!%p562_p1)
}
  0x24   :  { %25 = dma.hbm_to_vmem [thread:$0]  %s791_s0, 128, %s23_s16, [#allocation3]  }
  0x25   :  { %s566_s30 = scalar_lea.hbm %s794_s3, 1024 }
  0x26   :  { %p567_p2 = scmp.ne.s32.totalorder %s794_s3, %s566_s30  ;;  %p570_p3 = scmp.lt.u32.totalorder %s566_s30, %s794_s3 }
  0x28   :  { %p572_p4 = pnand %p570_p3, %p567_p2 }
  0x2a   :  { %575 = shalt.err (!%p572_p4)
}
  0x2b   :  { %s576_s14 = scalar_lea.vmem %s46_s18, 1024  ;;  %p581_p6 = scmp.lt.s32.totalorder %s46_s18, %s46_s18 }
  0x2c   :  { %p577_p5 = scmp.ne.s32.totalorder %s46_s18, %s576_s14  ;;  %p582_p7 = scmp.lt.s32.totalorder %s576_s14, %s576_s14 }
  0x2e   :  { %p583_p8 = por %p582_p7, %p581_p6 }
  0x30   :  { %p584_p9 = pnand %p583_p8, %p577_p5 }
  0x32   :  { %587 = shalt.err (!%p584_p9)
}
  0x33   :  { %51 = dma.hbm_to_vmem [thread:$0]  %s794_s3, 1024, %s46_s18, [#allocation6], %s641_s11, %s641_s11, %s642_s12  }
  0x34   :  { %s645_s16 = smov [#allocation8]   ;;  %s588_s21 = scalar_lea.hbm %s796_s5, 1024 }
  0x35   :  { %s59_s17 = sshll.u32 %s645_s16, 4  ;;  %p589_p10 = scmp.ne.s32.totalorder %s796_s5, %s588_s21  ;;  %s60_s17 = int_to_ptr.vmem [resolvable:$true] %s59_s17 }
  0x36   :  { %p592_p11 = scmp.lt.u32.totalorder %s588_s21, %s796_s5 }
  0x38   :  { %p594_p12 = pnand %p592_p11, %p589_p10 }
  0x3a   :  { %597 = shalt.err (!%p594_p12)
}
  0x3b   :  { %s598_s1 = scalar_lea.vmem %s60_s17, 1024  ;;  %p603_p0 = scmp.lt.s32.totalorder %s60_s17, %s60_s17 }
  0x3c   :  { %p599_p13 = scmp.ne.s32.totalorder %s60_s17, %s598_s1  ;;  %p604_p1 = scmp.lt.s32.totalorder %s598_s1, %s598_s1 }
  0x3e   :  { %p605_p2 = por %p604_p1, %p603_p0 }
  0x40   :  { %p606_p3 = pnand %p605_p2, %p599_p13 }
  0x42   :  { %609 = shalt.err (!%p606_p3)
}
  0x43   :  { %65 = dma.hbm_to_vmem [thread:$0]  %s796_s5, 1024, %s60_s17, [#allocation9], %s641_s11, %s641_s11, %s642_s12  }
  0x44   :  { %632 = dma.done.wait [#allocation3], 128  }
  0x45   :  { %633 = vsyncadd [#allocation3], 4294967168 }
  0x46   :  { %634 = dma.done.wait [#allocation6], 1280  }
  0x47   :  { %635 = vsyncadd [#allocation6], 4294966016 }
  0x48   :  { %636 = dma.done.wait [#allocation9], 1024  }
  0x49   :  { %637 = vsyncadd [#allocation9], 4294966272  ;;  %v646_v0 = vmov 0.0   ;;  %vm647_vm0 = vmmov 0   ;;  %v500_v1 = vld [vmem:[#allocation5] sm:$0xff]   ;;  %v501_v2 = vld [vmem:[#allocation5 + $0x8] sm:$0xff]  }
  0x4a   :  { %443 = vmatprep.subr.bf16.mxu0 %v646_v0  ;;  %447 = vmatprep.mubr.msk.bf16.mxu0 %vm647_vm0, %v646_v0  ;;  %v81_v3 = vld [vmem:[#allocation2] sm:$0xff]  ;;  %v502_v4 = vld [vmem:[#allocation7] sm:$0xff]   ;;  %vm106_vm1 = vcmask 261120   ;;  %v504_v7 = vld [vmem:[#allocation7 + $0x10] sm:$0xff]   ;;  %s648_s28 = smov [#allocation10]  }
  0x4b   :  { %451 = vmatprep.subr.bf16.mxu1 %v646_v0  ;;  %467 = vmatprep.mubr.msk.bf16.mxu1 %vm647_vm0, %v646_v0  ;;  %v87_v5 = vpack.c.bf16 %v81_v3, %v81_v3  ;;  %v503_v6 = vld [vmem:[#allocation7 + $0x8] sm:$0xff]   ;;  %v505_v8 = vld [vmem:[#allocation7 + $0x18] sm:$0xff]   ;;  %v506_v9 = vld [vmem:[#allocation7 + $0x20] sm:$0xff]   ;;  %s389_s29 = sshll.u32 %s648_s28, 4  ;;  %s390_s29 = int_to_ptr.vmem [resolvable:$true] %s389_s29 }
  0x4c   :  { %444 = vmatpush3.bf16.msra.mxu0 %v500_v1  ;;  %452 = vmatpush3.bf16.msra.mxu1 %v502_v4  ;;  %v507_v10 = vld [vmem:[#allocation7 + $0x28] sm:$0xff]   ;;  %v508_v11 = vld [vmem:[#allocation7 + $0x30] sm:$0xff]   ;;  %v509_v12 = vld [vmem:[#allocation7 + $0x38] sm:$0xff]   ;;  %p615_p5 = scmp.lt.s32.totalorder %s390_s29, %s390_s29 }
  0x4d   :  { %445 = vmatprep.subr.bf16.mxu0 %v646_v0  ;;  %453 = vmatprep.subr.bf16.mxu1 %v646_v0  ;;  %v510_v13 = vld [vmem:[#allocation8] sm:$0xff]   ;;  %v511_v14 = vld [vmem:[#allocation8 + $0x8] sm:$0xff]   ;;  %v512_v15 = vld [vmem:[#allocation8 + $0x10] sm:$0xff]  }
  0x4e   :  { %v400_v16 = vld [vmem:[%s793_s2] ss:$0 sm:$0xff]  ;;  %v513_v27 = vld [vmem:[#allocation8 + $0x18] sm:$0xff]   ;;  %v514_v28 = vld [vmem:[#allocation8 + $0x20] sm:$0xff]  }
  0x4f   :  { %v515_v29 = vld [vmem:[#allocation8 + $0x28] sm:$0xff]   ;;  %v516_v30 = vld [vmem:[#allocation8 + $0x30] sm:$0xff]   ;;  %v517_v31 = vld [vmem:[#allocation8 + $0x38] sm:$0xff]  }
  0x50   :  { %446 = vmatpush3.bf16.msra.mxu0 %v501_v2  ;;  %454 = vmatpush3.bf16.msra.mxu1 %v503_v6  ;;  %v404_v32 = vld [vmem:[%s795_s4] ss:$0 sm:$0xff]  ;;  %s610_s4 = scalar_lea.vmem %s390_s29, 128 }
  0x51   :  { %471 = vmatprep.subr.bf16.mxu0 %v646_v0  ;;  %455 = vmatprep.subr.bf16.mxu1 %v646_v0  ;;  %v413_v43 = vld [vmem:[%s797_s6] ss:$0 sm:$0xff]  ;;  %p611_p4 = scmp.ne.s32.totalorder %s390_s29, %s610_s4  ;;  %p616_p6 = scmp.lt.s32.totalorder %s610_s4, %s610_s4 }
  0x53   :  { %448 = vmatmul.mubr.msk.bf16.vlgmr.msra.gmra.mrb[0].mxu0 %vm106_vm1, %v87_v5  ;;  %p617_p7 = por %p616_p6, %p615_p5 }
  0x54   :  { %487 = vmatprep.mubr.msk.bf16.mxu0 %vm647_vm0, %v646_v0  ;;  %456 = vmatpush3.bf16.msra.mxu1 %v504_v7 }
  0x55   :  { %457 = vmatprep.subr.bf16.mxu1 %v646_v0  ;;  %472 = vmatpush3.bf16.msra.mxu0 %v510_v13  ;;  %p618_p8 = pnand %p617_p7, %p611_p4 }
  0x56   :  { %473 = vmatprep.subr.bf16.mxu0 %v646_v0 }
  0x58   :  { %458 = vmatpush3.bf16.msra.mxu1 %v505_v8 }
  0x59   :  { %459 = vmatprep.subr.bf16.mxu1 %v646_v0  ;;  %474 = vmatpush3.bf16.msra.mxu0 %v511_v14 }
  0x5a   :  { %475 = vmatprep.subr.bf16.mxu0 %v646_v0 }
  0x5c   :  { %460 = vmatpush3.bf16.msra.mxu1 %v506_v9 }
  0x5d   :  { %461 = vmatprep.subr.bf16.mxu1 %v646_v0  ;;  %476 = vmatpush3.bf16.msra.mxu0 %v512_v15 }
  0x5e   :  { %477 = vmatprep.subr.bf16.mxu0 %v646_v0 }
  0x60   :  { %462 = vmatpush3.bf16.msra.mxu1 %v507_v10 }
  0x61   :  { %463 = vmatprep.subr.bf16.mxu1 %v646_v0  ;;  %478 = vmatpush3.bf16.msra.mxu0 %v513_v27 }
  0x62   :  { %479 = vmatprep.subr.bf16.mxu0 %v646_v0 }
  0x64   :  { %464 = vmatpush3.bf16.msra.mxu1 %v508_v11 }
  0x65   :  { %465 = vmatprep.subr.bf16.mxu1 %v646_v0  ;;  %480 = vmatpush3.bf16.msra.mxu0 %v514_v28 }
  0x66   :  { %481 = vmatprep.subr.bf16.mxu0 %v646_v0 }
  0x68   :  { %466 = vmatpush3.bf16.msra.mxu1 %v509_v12 }
  0x69   :  { %482 = vmatpush3.bf16.msra.mxu0 %v515_v29 }
  0x6a   :  { %483 = vmatprep.subr.bf16.mxu0 %v646_v0 }
  0x6d   :  { %484 = vmatpush3.bf16.msra.mxu0 %v516_v30 }
  0x6e   :  { %485 = vmatprep.subr.bf16.mxu0 %v646_v0 }
  0x71   :  { %486 = vmatpush3.bf16.msra.mxu0 %v517_v31 }
 0x126   :  { %v144_v17 = vpop.f32.mrb[0].mxu0 }
 0x127   :  { %v145_v18 = vadd.f32 %v400_v16, %v144_v17  ;;  %v449_v19 = vpop.f32.mrb[1].mxu0 }
 0x128   :  { %v147_v20 = vpop.f32.mrb[2].mxu0 }
 0x129   :  { %v150_v21 = vmul.f32 0.5, %v145_v18  ;;  %v450_v22 = vpop.f32.mrb[3].mxu0 }
 0x12b   :  { %518 = vtanh.f32 %v150_v21 }
 0x135   :  { %v519_v23 = vpop.eup %518 }
 0x136   :  { %v152_v24 = vadd.f32 1.0, %v519_v23 }
 0x138   :  { %v153_v25 = vmul.f32 0.5, %v152_v24 }
 0x13a   :  { %v171_v26 = vpack.c.bf16 %v153_v25, %v153_v25 }
 0x13c   :  { %468 = vmatmul.mubr.bf16.vlgmr.msra.gmra.mrb[0].mxu1 %v171_v26 }
 0x20f   :  { %v260_v33 = vpop.f32.mrb[0].mxu1 }
 0x210   :  { %v261_v34 = vadd.f32 %v404_v32, %v260_v33  ;;  %v469_v35 = vpop.f32.mrb[1].mxu1 }
 0x211   :  { %v263_v36 = vpop.f32.mrb[2].mxu1 }
 0x212   :  { %v266_v37 = vmul.f32 0.5, %v261_v34  ;;  %v470_v38 = vpop.f32.mrb[3].mxu1 }
 0x214   :  { %520 = vtanh.f32 %v266_v37 }
 0x21e   :  { %v521_v39 = vpop.eup %520 }
 0x21f   :  { %v268_v40 = vadd.f32 1.0, %v521_v39 }
 0x221   :  { %v269_v41 = vmul.f32 0.5, %v268_v40 }
 0x223   :  { %v287_v42 = vpack.c.bf16 %v269_v41, %v269_v41 }
 0x225   :  { %488 = vmatmul.mubr.bf16.vlgmr.msra.gmra.mrb[4].mxu0 %v287_v42 }
 0x2f8   :  { %v376_v44 = vpop.f32.mrb[4].mxu0 }
 0x2f9   :  { %v377_v45 = vadd.f32 %v413_v43, %v376_v44  ;;  %v489_v46 = vpop.f32.mrb[5].mxu0 }
 0x2fa   :  { %v379_v47 = vpop.f32.mrb[6].mxu0 }
 0x2fb   :  { %382 = vst [vmem:[#allocation10] sm:$0xff] %v377_v45  ;;  %v490_v48 = vpop.f32.mrb[7].mxu0 }
 0x2fc   :  { %621 = shalt.err (!%p618_p8)
}
 0x2fd   :  { %s622_s6 = scalar_lea.hbm %s798_s7, 128 }
 0x2fe   :  { %p623_p9 = scmp.ne.s32.totalorder %s798_s7, %s622_s6  ;;  %p626_p10 = scmp.lt.u32.totalorder %s622_s6, %s798_s7 }
 0x300   :  { %p628_p11 = pnand %p626_p10, %p623_p9 }
 0x302   :  { %631 = shalt.err (!%p628_p11)
}
 0x303   :  { %392 = dma.vmem_to_hbm [thread:$0]  %s390_s29, 128, %s798_s7, [#allocation4]  }
 0x304   :  { %638 = dma.done.wait [#allocation4], 128  }
 0x305   :  { %639 = vsyncadd [#allocation4], 4294967168 }
 0x306   :  { %396 = vsyncpa [#allocation3], 1 }
 0x307   :  { %397 = vsyncpa [#allocation6], 1 }
 0x308   :  { %398 = vsyncpa [#allocation9], 1 }
 0x309   :  { %399 = vsyncpa [#allocation4], 1 }

</bundles_post_ra>
